<compile_context>
chip_gen: v7x
topology: tpu7x:2x2x1
jax: 0.10.0
libtpu: 0.0.40
codegen_flags: <defaults>
</compile_context>

<pallas_src>
import functools

import numpy as np
import jax
import jax.numpy as jnp
from jax import lax
from jax.experimental import pallas as pl
from jax.experimental.pallas import tpu as pltpu


# -----------------------------------------------------------------------------
# Kernel: fused conv1 -> ReLU -> conv2 with baked-in constant parameters
# -----------------------------------------------------------------------------
def _pruning_model_kernel(x_ref, o_ref, *, w1, b1, w2, b2):
    """x_ref: (C1_in, Hp, Wp) VMEM block (one batch element per grid step).
    o_ref: (C2_out, Hp-3, Wp-3) VMEM block.  w1/b1/w2/b2 are numpy constants."""
    c1_out, c1_in, k1, _ = w1.shape
    c2_out, c2_in, k2, _ = w2.shape
    _, hp, wp = x_ref.shape
    h1, w1o = hp - k1 + 1, wp - k1 + 1          # conv1 output spatial
    h2, w2o = h1 - k2 + 1, w1o - k2 + 1         # conv2 output spatial

    x = x_ref[...].astype(jnp.float32)

    # ---- conv1 + ReLU ----
    # Shifted views of each input channel are computed once and reused by all
    # output channels (weights only differ by a scalar per tap).
    x_shift = [
        [[x[ci, kh:kh + h1, kw:kw + w1o] for kw in range(k1)] for kh in range(k1)]
        for ci in range(c1_in)
    ]
    y1 = []
    chan_cache = {}  # identical (weights, bias) channels are traced only once
    for co in range(c1_out):
        key = (tuple(np.asarray(w1[co], np.float32).ravel().tolist()),
               float(b1[co]))
        if key not in chan_cache:
            acc = jnp.zeros((h1, w1o), jnp.float32)
            for ci in range(c1_in):
                for kh in range(k1):
                    for kw in range(k1):
                        wv = float(w1[co, ci, kh, kw])
                        if wv != 0.0:
                            acc = acc + x_shift[ci][kh][kw] * wv
            chan_cache[key] = jnp.maximum(acc + float(b1[co]), 0.0)
        y1.append(chan_cache[key])

    # ---- conv2 ----
    # Shifted views are built once per *unique* y1 tensor and reused across
    # input channels; every output channel is written straight into o_ref.
    shift_cache = {}

    def shifts(t):
        if id(t) not in shift_cache:
            shift_cache[id(t)] = [
                [t[kh:kh + h2, kw:kw + w2o] for kw in range(k2)]
                for kh in range(k2)
            ]
        return shift_cache[id(t)]

    for co in range(c2_out):
        acc = jnp.zeros((h2, w2o), jnp.float32)
        for ci in range(c2_in):
            ysh = shifts(y1[ci])
            for kh in range(k2):
                for kw in range(k2):
                    wv = float(w2[co, ci, kh, kw])
                    if wv != 0.0:
                        acc = acc + ysh[kh][kw] * wv
        o_ref[co] = (acc + float(b2[co])).astype(o_ref.dtype)


# -----------------------------------------------------------------------------
# Wrapper
# -----------------------------------------------------------------------------
def pruning_test_model_forward(x, w1, b1, w2, b2):
    """x: (N, 1, H, W) float32, NCHW.  Returns (N, 1, H-3, W-3)."""
    n, c_in, h, w = x.shape
    c1_out, c1_in, k1, _ = w1.shape
    c2_out, c2_in, k2, _ = w2.shape
    assert c_in == c1_in and c2_in == c1_out

    shrink = (k1 - 1) + (k2 - 1)                 # spatial shrink across both convs
    h_out, w_out = h - shrink, w - shrink

    # Zero-pad bottom/right so the kernel's output block keeps the full input
    # spatial extent (denser, non-ragged stores).  The padded rows/cols only
    # ever read zeros and are sliced off below -> exact semantics preserved.
    x_pad = jnp.pad(x, ((0, 0), (0, 0), (0, shrink), (0, shrink)))
    hp, wp = h + shrink, w + shrink              # kernel input spatial
    h_op, w_op = h, w                            # kernel (padded) output spatial

    kernel = functools.partial(
        _pruning_model_kernel,
        w1=np.asarray(w1, np.float32), b1=np.asarray(b1, np.float32),
        w2=np.asarray(w2, np.float32), b2=np.asarray(b2, np.float32),
    )

    out_padded = pl.pallas_call(
        kernel,
        out_shape=jax.ShapeDtypeStruct((n, c2_out, h_op, w_op), x.dtype),
        grid=(n,),
        in_specs=[pl.BlockSpec((None, c1_in, hp, wp), lambda i: (i, 0, 0, 0))],
        out_specs=pl.BlockSpec((None, c2_out, h_op, w_op), lambda i: (i, 0, 0, 0)),
        compiler_params=pltpu.CompilerParams(
            dimension_semantics=("parallel",)),
    )(x_pad)

    return out_padded[:, :, :h_out, :w_out]


# -----------------------------------------------------------------------------
# Deterministic parameter construction (mirrors NNCF create_conv / fill_*)
# -----------------------------------------------------------------------------
def make_params():
    # conv1: fill(9) + eye(2) on every (out, in) slice; bias fill(-2)
    w1 = np.full((3, 1, 2, 2), 9.0, np.float32) + np.eye(2, dtype=np.float32)
    b1 = np.full((3,), -2.0, np.float32)
    # conv2: fill(-10) + eye(3); bias fill(0)
    w2 = np.full((1, 3, 3, 3), -10.0, np.float32) + np.eye(3, dtype=np.float32)
    b2 = np.zeros((1,), np.float32)
    return w1, b1, w2, b2


def reference_forward(x, w1, b1, w2, b2):
    """Pure-JAX reference (lax conv) for correctness checking."""
    dn = ("NCHW", "OIHW", "NCHW")
    y = lax.conv_general_dilated(x, jnp.asarray(w1), (1, 1), "VALID",
                                 dimension_numbers=dn)
    y = y + jnp.asarray(b1)[None, :, None, None]
    y = jnp.maximum(y, 0.0)
    y = lax.conv_general_dilated(y, jnp.asarray(w2), (1, 1), "VALID",
                                 dimension_numbers=dn)
    y = y + jnp.asarray(b2)[None, :, None, None]
    return y


if __name__ == "__main__":
    key = jax.random.PRNGKey(0)
    x = jax.random.normal(key, (2, 1, 16, 16), dtype=jnp.float32)

    w1, b1, w2, b2 = make_params()

    out = jax.block_until_ready(pruning_test_model_forward(x, w1, b1, w2, b2))
    ref = jax.block_until_ready(reference_forward(x, w1, b1, w2, b2))

    assert out.shape == (2, 1, 13, 13), out.shape
    np.testing.assert_allclose(np.asarray(out), np.asarray(ref),
                               rtol=1e-5, atol=1e-5)
    print("KERNEL_OK")
</pallas_src>

<mosaic_0001>
module attributes {stable_mosaic.version = 11 : i64} {
  func.func @_pruning_model_kernel(%arg0: i32, %arg1: memref<1x1x19x19xf32, #tpu.memory_space<vmem>>, %arg2: memref<1x1x16x16xf32, #tpu.memory_space<vmem>>) attributes {dimension_semantics = [#tpu.dimension_semantics<parallel>], iteration_bounds = array<i64: 2>, scalar_prefetch = 0 : i64, scratch_operands = 0 : i64, tpu.core_type = #tpu.core_type<tc>, window_params = [{transform_indices = @transform_0, window_bounds = array<i64: 1, 1, 19, 19>}, {transform_indices = @transform_1, window_bounds = array<i64: 1, 1, 16, 16>}]} {
    %c0 = arith.constant 0 : index
    %c0_0 = arith.constant 0 : index
    %c0_1 = arith.constant 0 : index
    %c0_2 = arith.constant 0 : index
    %0 = vector.load %arg1[%c0, %c0_0, %c0_1, %c0_2] : memref<1x1x19x19xf32, #tpu.memory_space<vmem>>, vector<1x1x19x19xf32>
    %1 = vector.shape_cast %0 : vector<1x1x19x19xf32> to vector<1x19x19xf32>
    %2 = vector.extract_strided_slice %1 {offsets = [0, 0, 0], sizes = [1, 18, 18], strides = [1, 1, 1]} : vector<1x19x19xf32> to vector<1x18x18xf32>
    %3 = vector.shape_cast %2 : vector<1x18x18xf32> to vector<18x18xf32>
    %4 = vector.extract_strided_slice %1 {offsets = [0, 0, 1], sizes = [1, 18, 18], strides = [1, 1, 1]} : vector<1x19x19xf32> to vector<1x18x18xf32>
    %5 = vector.shape_cast %4 : vector<1x18x18xf32> to vector<18x18xf32>
    %6 = vector.extract_strided_slice %1 {offsets = [0, 1, 0], sizes = [1, 18, 18], strides = [1, 1, 1]} : vector<1x19x19xf32> to vector<1x18x18xf32>
    %7 = vector.shape_cast %6 : vector<1x18x18xf32> to vector<18x18xf32>
    %8 = vector.extract_strided_slice %1 {offsets = [0, 1, 1], sizes = [1, 18, 18], strides = [1, 1, 1]} : vector<1x19x19xf32> to vector<1x18x18xf32>
    %9 = vector.shape_cast %8 : vector<1x18x18xf32> to vector<18x18xf32>
    %cst = arith.constant 0.000000e+00 : f32
    %10 = vector.broadcast %cst : f32 to vector<18x18xf32>
    %cst_3 = arith.constant 1.000000e+01 : f32
    %11 = vector.broadcast %cst_3 : f32 to vector<18x18xf32>
    %12 = arith.mulf %3, %11 : vector<18x18xf32>
    %13 = arith.addf %10, %12 : vector<18x18xf32>
    %cst_4 = arith.constant 9.000000e+00 : f32
    %14 = vector.broadcast %cst_4 : f32 to vector<18x18xf32>
    %15 = arith.mulf %5, %14 : vector<18x18xf32>
    %16 = arith.addf %13, %15 : vector<18x18xf32>
    %cst_5 = arith.constant 9.000000e+00 : f32
    %17 = vector.broadcast %cst_5 : f32 to vector<18x18xf32>
    %18 = arith.mulf %7, %17 : vector<18x18xf32>
    %19 = arith.addf %16, %18 : vector<18x18xf32>
    %cst_6 = arith.constant 1.000000e+01 : f32
    %20 = vector.broadcast %cst_6 : f32 to vector<18x18xf32>
    %21 = arith.mulf %9, %20 : vector<18x18xf32>
    %22 = arith.addf %19, %21 : vector<18x18xf32>
    %cst_7 = arith.constant -2.000000e+00 : f32
    %23 = vector.broadcast %cst_7 : f32 to vector<18x18xf32>
    %24 = arith.addf %22, %23 : vector<18x18xf32>
    %cst_8 = arith.constant 0.000000e+00 : f32
    %25 = vector.broadcast %cst_8 : f32 to vector<18x18xf32>
    %26 = arith.maximumf %24, %25 : vector<18x18xf32>
    %cst_9 = arith.constant 0.000000e+00 : f32
    %27 = vector.broadcast %cst_9 : f32 to vector<16x16xf32>
    %28 = vector.extract_strided_slice %26 {offsets = [0, 0], sizes = [16, 16], strides = [1, 1]} : vector<18x18xf32> to vector<16x16xf32>
    %29 = vector.extract_strided_slice %26 {offsets = [0, 1], sizes = [16, 16], strides = [1, 1]} : vector<18x18xf32> to vector<16x16xf32>
    %30 = vector.extract_strided_slice %26 {offsets = [0, 2], sizes = [16, 16], strides = [1, 1]} : vector<18x18xf32> to vector<16x16xf32>
    %31 = vector.extract_strided_slice %26 {offsets = [1, 0], sizes = [16, 16], strides = [1, 1]} : vector<18x18xf32> to vector<16x16xf32>
    %32 = vector.extract_strided_slice %26 {offsets = [1, 1], sizes = [16, 16], strides = [1, 1]} : vector<18x18xf32> to vector<16x16xf32>
    %33 = vector.extract_strided_slice %26 {offsets = [1, 2], sizes = [16, 16], strides = [1, 1]} : vector<18x18xf32> to vector<16x16xf32>
    %34 = vector.extract_strided_slice %26 {offsets = [2, 0], sizes = [16, 16], strides = [1, 1]} : vector<18x18xf32> to vector<16x16xf32>
    %35 = vector.extract_strided_slice %26 {offsets = [2, 1], sizes = [16, 16], strides = [1, 1]} : vector<18x18xf32> to vector<16x16xf32>
    %36 = vector.extract_strided_slice %26 {offsets = [2, 2], sizes = [16, 16], strides = [1, 1]} : vector<18x18xf32> to vector<16x16xf32>
    %cst_10 = arith.constant -9.000000e+00 : f32
    %37 = vector.broadcast %cst_10 : f32 to vector<16x16xf32>
    %38 = arith.mulf %28, %37 : vector<16x16xf32>
    %39 = arith.addf %27, %38 : vector<16x16xf32>
    %cst_11 = arith.constant -1.000000e+01 : f32
    %40 = vector.broadcast %cst_11 : f32 to vector<16x16xf32>
    %41 = arith.mulf %29, %40 : vector<16x16xf32>
    %42 = arith.addf %39, %41 : vector<16x16xf32>
    %cst_12 = arith.constant -1.000000e+01 : f32
    %43 = vector.broadcast %cst_12 : f32 to vector<16x16xf32>
    %44 = arith.mulf %30, %43 : vector<16x16xf32>
    %45 = arith.addf %42, %44 : vector<16x16xf32>
    %cst_13 = arith.constant -1.000000e+01 : f32
    %46 = vector.broadcast %cst_13 : f32 to vector<16x16xf32>
    %47 = arith.mulf %31, %46 : vector<16x16xf32>
    %48 = arith.addf %45, %47 : vector<16x16xf32>
    %cst_14 = arith.constant -9.000000e+00 : f32
    %49 = vector.broadcast %cst_14 : f32 to vector<16x16xf32>
    %50 = arith.mulf %32, %49 : vector<16x16xf32>
    %51 = arith.addf %48, %50 : vector<16x16xf32>
    %cst_15 = arith.constant -1.000000e+01 : f32
    %52 = vector.broadcast %cst_15 : f32 to vector<16x16xf32>
    %53 = arith.mulf %33, %52 : vector<16x16xf32>
    %54 = arith.addf %51, %53 : vector<16x16xf32>
    %cst_16 = arith.constant -1.000000e+01 : f32
    %55 = vector.broadcast %cst_16 : f32 to vector<16x16xf32>
    %56 = arith.mulf %34, %55 : vector<16x16xf32>
    %57 = arith.addf %54, %56 : vector<16x16xf32>
    %cst_17 = arith.constant -1.000000e+01 : f32
    %58 = vector.broadcast %cst_17 : f32 to vector<16x16xf32>
    %59 = arith.mulf %35, %58 : vector<16x16xf32>
    %60 = arith.addf %57, %59 : vector<16x16xf32>
    %cst_18 = arith.constant -9.000000e+00 : f32
    %61 = vector.broadcast %cst_18 : f32 to vector<16x16xf32>
    %62 = arith.mulf %36, %61 : vector<16x16xf32>
    %63 = arith.addf %60, %62 : vector<16x16xf32>
    %cst_19 = arith.constant -9.000000e+00 : f32
    %64 = vector.broadcast %cst_19 : f32 to vector<16x16xf32>
    %65 = arith.mulf %28, %64 : vector<16x16xf32>
    %66 = arith.addf %63, %65 : vector<16x16xf32>
    %cst_20 = arith.constant -1.000000e+01 : f32
    %67 = vector.broadcast %cst_20 : f32 to vector<16x16xf32>
    %68 = arith.mulf %29, %67 : vector<16x16xf32>
    %69 = arith.addf %66, %68 : vector<16x16xf32>
    %cst_21 = arith.constant -1.000000e+01 : f32
    %70 = vector.broadcast %cst_21 : f32 to vector<16x16xf32>
    %71 = arith.mulf %30, %70 : vector<16x16xf32>
    %72 = arith.addf %69, %71 : vector<16x16xf32>
    %cst_22 = arith.constant -1.000000e+01 : f32
    %73 = vector.broadcast %cst_22 : f32 to vector<16x16xf32>
    %74 = arith.mulf %31, %73 : vector<16x16xf32>
    %75 = arith.addf %72, %74 : vector<16x16xf32>
    %cst_23 = arith.constant -9.000000e+00 : f32
    %76 = vector.broadcast %cst_23 : f32 to vector<16x16xf32>
    %77 = arith.mulf %32, %76 : vector<16x16xf32>
    %78 = arith.addf %75, %77 : vector<16x16xf32>
    %cst_24 = arith.constant -1.000000e+01 : f32
    %79 = vector.broadcast %cst_24 : f32 to vector<16x16xf32>
    %80 = arith.mulf %33, %79 : vector<16x16xf32>
    %81 = arith.addf %78, %80 : vector<16x16xf32>
    %cst_25 = arith.constant -1.000000e+01 : f32
    %82 = vector.broadcast %cst_25 : f32 to vector<16x16xf32>
    %83 = arith.mulf %34, %82 : vector<16x16xf32>
    %84 = arith.addf %81, %83 : vector<16x16xf32>
    %cst_26 = arith.constant -1.000000e+01 : f32
    %85 = vector.broadcast %cst_26 : f32 to vector<16x16xf32>
    %86 = arith.mulf %35, %85 : vector<16x16xf32>
    %87 = arith.addf %84, %86 : vector<16x16xf32>
    %cst_27 = arith.constant -9.000000e+00 : f32
    %88 = vector.broadcast %cst_27 : f32 to vector<16x16xf32>
    %89 = arith.mulf %36, %88 : vector<16x16xf32>
    %90 = arith.addf %87, %89 : vector<16x16xf32>
    %cst_28 = arith.constant -9.000000e+00 : f32
    %91 = vector.broadcast %cst_28 : f32 to vector<16x16xf32>
    %92 = arith.mulf %28, %91 : vector<16x16xf32>
    %93 = arith.addf %90, %92 : vector<16x16xf32>
    %cst_29 = arith.constant -1.000000e+01 : f32
    %94 = vector.broadcast %cst_29 : f32 to vector<16x16xf32>
    %95 = arith.mulf %29, %94 : vector<16x16xf32>
    %96 = arith.addf %93, %95 : vector<16x16xf32>
    %cst_30 = arith.constant -1.000000e+01 : f32
    %97 = vector.broadcast %cst_30 : f32 to vector<16x16xf32>
    %98 = arith.mulf %30, %97 : vector<16x16xf32>
    %99 = arith.addf %96, %98 : vector<16x16xf32>
    %cst_31 = arith.constant -1.000000e+01 : f32
    %100 = vector.broadcast %cst_31 : f32 to vector<16x16xf32>
    %101 = arith.mulf %31, %100 : vector<16x16xf32>
    %102 = arith.addf %99, %101 : vector<16x16xf32>
    %cst_32 = arith.constant -9.000000e+00 : f32
    %103 = vector.broadcast %cst_32 : f32 to vector<16x16xf32>
    %104 = arith.mulf %32, %103 : vector<16x16xf32>
    %105 = arith.addf %102, %104 : vector<16x16xf32>
    %cst_33 = arith.constant -1.000000e+01 : f32
    %106 = vector.broadcast %cst_33 : f32 to vector<16x16xf32>
    %107 = arith.mulf %33, %106 : vector<16x16xf32>
    %108 = arith.addf %105, %107 : vector<16x16xf32>
    %cst_34 = arith.constant -1.000000e+01 : f32
    %109 = vector.broadcast %cst_34 : f32 to vector<16x16xf32>
    %110 = arith.mulf %34, %109 : vector<16x16xf32>
    %111 = arith.addf %108, %110 : vector<16x16xf32>
    %cst_35 = arith.constant -1.000000e+01 : f32
    %112 = vector.broadcast %cst_35 : f32 to vector<16x16xf32>
    %113 = arith.mulf %35, %112 : vector<16x16xf32>
    %114 = arith.addf %111, %113 : vector<16x16xf32>
    %cst_36 = arith.constant -9.000000e+00 : f32
    %115 = vector.broadcast %cst_36 : f32 to vector<16x16xf32>
    %116 = arith.mulf %36, %115 : vector<16x16xf32>
    %117 = arith.addf %114, %116 : vector<16x16xf32>
    %cst_37 = arith.constant 0.000000e+00 : f32
    %118 = vector.broadcast %cst_37 : f32 to vector<16x16xf32>
    %119 = arith.addf %117, %118 : vector<16x16xf32>
    %c0_38 = arith.constant 0 : index
    %c0_39 = arith.constant 0 : index
    %c0_40 = arith.constant 0 : index
    %c0_41 = arith.constant 0 : index
    %120 = vector.load %arg2[%c0_38, %c0_39, %c0_40, %c0_41] : memref<1x1x16x16xf32, #tpu.memory_space<vmem>>, vector<1x1x16x16xf32>
    %121 = vector.shape_cast %120 : vector<1x1x16x16xf32> to vector<16x16xf32>
    %122 = vector.shape_cast %119 : vector<16x16xf32> to vector<1x1x16x16xf32>
    tpu.vector_store %arg2[%c0_38, %c0_39, %c0_40, %c0_41], %122 {strides = array<i32>} : memref<1x1x16x16xf32, #tpu.memory_space<vmem>>, vector<1x1x16x16xf32>,
    return
  }
  func.func @transform_0(%arg0: i32) -> (i32, i32, i32, i32) {
    %c0_i32 = arith.constant 0 : i32
    %c0_i32_0 = arith.constant 0 : i32
    %c0_i32_1 = arith.constant 0 : i32
    %c0_i32_2 = arith.constant 0 : i32
    return %arg0, %c0_i32, %c0_i32_0, %c0_i32_1 : i32, i32, i32, i32
  }
  func.func @transform_1(%arg0: i32) -> (i32, i32, i32, i32) {
    %c0_i32 = arith.constant 0 : i32
    %c0_i32_0 = arith.constant 0 : i32
    %c0_i32_1 = arith.constant 0 : i32
    %c0_i32_2 = arith.constant 0 : i32
    return %arg0, %c0_i32, %c0_i32_0, %c0_i32_1 : i32, i32, i32, i32
  }
}

</mosaic_0001>

<bundles_post_ra>
// kernel: tpu_custom_call.1
= control target key start
LH: loop header
LB: loop body
LE: loop exit
PB: predicated region body
PF: predicated region fallthrough
CT: control target
= control target key end

     0   :  { %6 = vsyncpa [#allocation3], 0  ;;  %s688_s0 = inlined_call_operand.vmem [shape: f32[2,1,19,19], index: 0, kind: input, shape index: {}]   ;;  %s689_s1 = inlined_call_operand.hbm [shape: f32[2,1,16,16], index: 1, kind: output, shape index: {}]  }
   0x1   :  { %8 = vsyncpa [#allocation3 + $0x1], 0  ;;  %s523_s6 = smov 0   ;;  %s525_s7 = smov 0  }
   0x2   :  { %s527_s8 = smov 0   ;;  %s529_s9 = smov 0  }
   0x3 LB: > { %s544_s10 = sadd.s32 4294967295, %s506_s9   ;;  %s388_s11 = sadd.s32 4294967294, %s506_s9   ;;  %s506_s9 = sphi %s529_s9, %s695_s9   ;;  %s502_s8 = sphi %s527_s8, %s694_s8   ;;  %s498_s7 = sphi %s525_s7, %s693_s7   ;;  %s494_s6 = sphi %s523_s6, %s692_s6  }
   0x4   : > { %s548_s12 = sadd.s32 1, %s506_s9   ;;  %s47_s13 = sadd.s32 1, %s502_s8 }
   0x5   : > { %s44_s14 = ssub.s32 %s506_s9, %s548_s12  ;;  %p57_p0 = scmp.ne.s32.totalorder %s502_s8, %s498_s7 }
   0x6   : > { %p45_p1 = scmp.eq.s32.totalorder %s44_s14, 0  ;;  %p58_p2 = scmp.eq.s32.totalorder %s544_s10, 1 }
   0x7   : > { %p63_p3 = scmp.ne.s32.totalorder %s498_s7, %s494_s6  ;;  %p64_p4 = scmp.eq.s32.totalorder %s388_s11, 1 }
   0x8   : > { %s559_s15 = scalar_select %p45_p1, %s502_s8, %s47_s13  }
   0x9   : > { %p561_p5 = por %p58_p2, %p57_p0  ;;  %p565_p6 = por %p64_p4, %p63_p3 }
   0xa   : > { %p391_p7 = scmp.ge.s32.totalorder %s506_s9, 1  ;;  %p90_p8 = scmp.lt.s32.totalorder %s506_s9, 3 }
   0xc   : > { %p91_p9 = pnand %p391_p7, %p90_p8 }
   0xd   : > { %p110_p10 = scmp.lt.s32.totalorder (!%p91_p9), %s544_s10, 1  ;;  %s508_s23 = smov (!%p91_p9), 127   ;;  %vm142_vm0 = vcmask (!%p91_p9), 1046528   ;;  %vm240_vm1 = vcmask (!%p91_p9), 1045504   ;;  %vm309_vm2 = vcmask (!%p91_p9), 130048  }
   0xe   : > { %94 = sbr.rel (%p91_p9) target bundleno = 348 (0x15c), region = 24  ;;  %s509_s24 = smov (!%p91_p9), 126  }
   0xf   : > { %s107_s25 = sand.u32 (!%p91_p9), 1, %s498_s7   ;;  %s399_s29 = sshll.u32 (!%p91_p9), %s544_s10, 8 }
  0x10   : > { %s392_s26 = sshll.u32 (!%p91_p9), %s107_s25, 4  ;;  %s645_s3 = scalar_lea.hbm (!%p91_p9), %s689_s1, %s399_s29 }
  0x11   : > { %s109_s27 = scalar_lea.vmem (!%p91_p9), [#allocation2], %s392_s26  ;;  %s647_s4 = scalar_lea.sflag (!%p91_p9), [#allocation3], %s107_s25 }
  0x12   : > { %s326_s28 = sshll.u32 (!%p91_p9), %s109_s27, 4  ;;  %s640_s28 = int_to_ptr.vmem [resolvable:$true] %s326_s28 }
  0x13   : > { %s444_s5 = scalar_lea.vmem (!%p91_p9), %s640_s28, 256 }
  0x14   : > { %p445_p11 = scmp.ne.s32.totalorder (!%p91_p9), %s640_s28, %s444_s5 }
  0x15   : > { %s111_s18 = scalar_select %p110_p10, %s544_s10, 1 }
  0x16   : > { %p446_p12 = pnand %p445_p11, %p561_p5  ;;  %s510_s10 = smov [#allocation2]  }
  0x17   : > { %s400_s19 = smul.u32 24, %s111_s18  ;;  %s448_s11 = sshll.u32 %s510_s10, 4  ;;  %s449_s11 = int_to_ptr.vmem [resolvable:$false] %s448_s11 }
  0x18   : > { %p447_p13 = pneg %p446_p12  ;;  %s450_s13 = scalar_lea.vmem %s449_s11, 512 }
  0x19   : > { %s114_s22 = scalar_lea.vmem %s688_s0, %s400_s19  ;;  %p451_p0 = scmp.lt.s32.totalorder %s640_s28, %s449_s11 }
  0x1a   : > { %v117_v0 = vld [vmem:[%s114_s22 + $0x10] sm:$0x7]  ;;  %v115_v1 = vld [vmem:[%s114_s22] sm:$0xff]  ;;  %v116_v2 = vld [vmem:[%s114_s22 + $0x8] sm:$0xff]  ;;  %p452_p1 = scmp.lt.s32.totalorder %s450_s13, %s444_s5 }
  0x1b   : > { %v126_v3 = vmul.f32 9.0, %v117_v0  ;;  %v120_v4 = vmul.f32 10.0, %v117_v0  ;;  %v124_v5 = vmul.f32 9.0, %v115_v1  ;;  %v118_v6 = vmul.f32 10.0, %v115_v1 }
  0x1c   : > { %v119_v7 = vmul.f32 10.0, %v116_v2  ;;  %v125_v8 = vmul.f32 9.0, %v116_v2  ;;  %p453_p2 = por %p452_p1, %p451_p0 }
  0x1d   : > { %134 = vrot.lane.b32.xlu1 %v126_v3, %s508_s23  ;;  %v146_v9 = vrot.slane %v126_v3, 1  ;;  %130 = vrot.lane.b32.xlu0 %v124_v5, %s508_s23  ;;  %v143_v10 = vrot.slane %v124_v5, 1  ;;  %v157_v11 = vrot.slane %v118_v6, 1  ;;  %v160_v12 = vrot.slane %v120_v4, 1 }
  0x1e   : > { %v144_v13 = vrot.slane %v125_v8, 1  ;;  %v158_v14 = vrot.slane %v119_v7, 1  ;;  %p454_p3 = pnand %p453_p2, %p447_p13 }
  0x20   : > { %v159_v15 = vsel %vm142_vm0, %v157_v11, %v158_v14  ;;  %v145_v16 = vsel %vm142_vm0, %v143_v10, %v144_v13  ;;  %v147_v17 = vsel %vm142_vm0, %v144_v13, %v146_v9  ;;  %v161_v18 = vsel %vm142_vm0, %v158_v14, %v160_v12 }
  0x21   : > { %132 = vrot.lane.b32.xlu0 %v125_v8, %s508_s23  ;;  %162 = vrot.lane.b32.xlu1 %v159_v15, %s508_s23 }
  0x25   : > { %164 = vrot.lane.b32.xlu0 %v161_v18, %s508_s23  ;;  %166 = vrot.lane.b32.xlu1 %v160_v12, %s508_s23 }
  0x8f   : > { %v135_v19 = vpop.permute.xlu1 %134  ;;  %v131_v20 = vpop.permute.xlu0 %130 }
  0x90   : > { %v141_v21 = vadd.f32 %v135_v19, %v120_v4  ;;  %v139_v22 = vadd.f32 %v131_v20, %v118_v6 }
  0x92   : > { %v151_v23 = vadd.f32 %v145_v16, %v139_v22  ;;  %v153_v28 = vadd.f32 %v146_v9, %v141_v21 }
  0x93   : > { %v133_v24 = vpop.permute.xlu0 %132  ;;  %v163_v25 = vpop.permute.xlu1 %162 }
  0x94   : > { %v140_v26 = vadd.f32 %v133_v24, %v119_v7  ;;  %v171_v27 = vadd.f32 %v163_v25, %v151_v23 }
  0x96   : > { %v174_v29 = vadd.f32 -2.0, %v171_v27  ;;  %v152_v30 = vadd.f32 %v147_v17, %v140_v26 }
  0x97   : > { %v165_v31 = vpop.permute.xlu0 %164  ;;  %v167_v32 = vpop.permute.xlu1 %166 }
  0x98   : > { %v177_v33 = vmax.f32 %v174_v29, 0.0  ;;  %v172_v34 = vadd.f32 %v165_v31, %v152_v30  ;;  %v173_v35 = vadd.f32 %v167_v32, %v153_v28 }
  0x9a   : > { %v184_v36 = vmul.f32 -10.0, %v177_v33  ;;  %v175_v37 = vadd.f32 -2.0, %v172_v34  ;;  %v176_v38 = vadd.f32 -2.0, %v173_v35  ;;  %v586_v39 = vmul.f32 -9.0, %v177_v33 }
  0x9c   : > { %v178_v40 = vmax.f32 %v175_v37, 0.0  ;;  %v179_v41 = vmax.f32 %v176_v38, 0.0  ;;  %188 = vrot.lane.b32.xlu0 %v184_v36, %s508_s23  ;;  %v219_v48 = vrot.slane %v586_v39, 1  ;;  %v206_v50 = vrot.slane %v184_v36, 1 }
  0x9d   : > { %v241_v53 = vrot.slane %v184_v36, 2  ;;  %v258_v62 = vrot.slane %v586_v39, 2 }
  0x9e   : > { %v589_v42 = vmul.f32 -9.0, %v178_v40  ;;  %v185_v43 = vmul.f32 -10.0, %v178_v40  ;;  %v204_v44 = vmul.f32 -10.0, %v179_v41  ;;  %v215_v45 = vmul.f32 -9.0, %v179_v41 }
  0xa0   : > { %v209_v46 = vrot.slane %v204_v44, 1  ;;  %v244_v47 = vrot.slane %v204_v44, 2  ;;  %190 = vrot.lane.b32.xlu1 %v185_v43, %s508_s23  ;;  %196 = vrot.lane.b32.xlu0 %v184_v36, %s509_s24  ;;  %v220_v49 = vrot.slane %v589_v42, 1  ;;  %v207_v51 = vrot.slane %v185_v43, 1 }
  0xa1   : > { %v242_v52 = vrot.slane %v185_v43, 2  ;;  %v222_v54 = vrot.slane %v215_v45, 1  ;;  %v259_v61 = vrot.slane %v589_v42, 2  ;;  %v261_v63 = vrot.slane %v215_v45, 2 }
  0xa2   : > { %v221_v55 = vsel %vm142_vm0, %v219_v48, %v220_v49  ;;  %v596_v56 = vsel %vm142_vm0, %v206_v50, %v207_v51  ;;  %v599_v57 = vsel %vm142_vm0, %v207_v51, %v209_v46 }
  0xa3   : > { %v603_v58 = vsel %vm240_vm1, %v241_v53, %v242_v52  ;;  %v606_v59 = vsel %vm240_vm1, %v242_v52, %v244_v47  ;;  %v223_v60 = vsel %vm142_vm0, %v220_v49, %v222_v54  ;;  %v260_v0 = vsel %vm240_vm1, %v258_v62, %v259_v61 }
  0xa4   : > { %198 = vrot.lane.b32.xlu1 %v185_v43, %s509_s24  ;;  %224 = vrot.lane.b32.xlu0 %v221_v55, %s508_s23  ;;  %v262_v1 = vsel %vm240_vm1, %v259_v61, %v261_v63 }
  0xa8   : > { %226 = vrot.lane.b32.xlu1 %v223_v60, %s508_s23  ;;  %232 = vrot.lane.b32.xlu0 %v596_v56, %s509_s24 }
  0xac   : > { %234 = vrot.lane.b32.xlu1 %v599_v57, %s509_s24  ;;  %250 = vrot.lane.b32.xlu0 %v603_v58, %s508_s23 }
  0xb0   : > { %252 = vrot.lane.b32.xlu1 %v606_v59, %s508_s23  ;;  %263 = vrot.lane.b32.xlu0 %v260_v0, %s509_s24 }
  0xb4   : > { %265 = vrot.lane.b32.xlu1 %v262_v1, %s509_s24 }
 0x10e   : > { %v189_v2 = vpop.permute.xlu0 %188 }
 0x10f   : > { %v194_v3 = vadd.f32 %v189_v2, %v586_v39 }
 0x112   : > { %v191_v4 = vpop.permute.xlu1 %190  ;;  %v197_v5 = vpop.permute.xlu0 %196 }
 0x113   : > { %v202_v6 = vadd.f32 %v197_v5, %v194_v3  ;;  %v195_v7 = vadd.f32 %v191_v4, %v589_v42 }
 0x115   : > { %v213_v8 = vadd.f32 %v596_v56, %v202_v6 }
 0x116   : > { %v199_v9 = vpop.permute.xlu1 %198  ;;  %v225_v10 = vpop.permute.xlu0 %224 }
 0x117   : > { %v203_v11 = vadd.f32 %v199_v9, %v195_v7  ;;  %v230_v12 = vadd.f32 %v225_v10, %v213_v8 }
 0x119   : > { %v214_v13 = vadd.f32 %v599_v57, %v203_v11 }
 0x11a   : > { %v227_v14 = vpop.permute.xlu1 %226  ;;  %v233_v15 = vpop.permute.xlu0 %232 }
 0x11b   : > { %v238_v16 = vadd.f32 %v233_v15, %v230_v12  ;;  %v231_v17 = vadd.f32 %v227_v14, %v214_v13 }
 0x11d   : > { %v248_v18 = vadd.f32 %v603_v58, %v238_v16 }
 0x11e   : > { %v235_v19 = vpop.permute.xlu1 %234  ;;  %v251_v20 = vpop.permute.xlu0 %250 }
 0x11f   : > { %v239_v21 = vadd.f32 %v235_v19, %v231_v17  ;;  %v256_v22 = vadd.f32 %v251_v20, %v248_v18 }
 0x121   : > { %v249_v23 = vadd.f32 %v606_v59, %v239_v21 }
 0x122   : > { %v253_v24 = vpop.permute.xlu1 %252  ;;  %v264_v25 = vpop.permute.xlu0 %263 }
 0x123   : > { %v269_v26 = vadd.f32 %v264_v25, %v256_v22  ;;  %v257_v27 = vadd.f32 %v253_v24, %v249_v23 }
 0x125   : > { %v271_v28 = vadd.f32 %v269_v26, %v586_v39 }
 0x126   : > { %v266_v29 = vpop.permute.xlu1 %265 }
 0x127   : > { %v273_v30 = vadd.f32 %v271_v28, %v189_v2  ;;  %v270_v31 = vadd.f32 %v266_v29, %v257_v27 }
 0x129   : > { %v275_v32 = vadd.f32 %v273_v30, %v197_v5  ;;  %v272_v33 = vadd.f32 %v270_v31, %v589_v42 }
 0x12b   : > { %v277_v34 = vadd.f32 %v275_v32, %v596_v56  ;;  %v274_v35 = vadd.f32 %v272_v33, %v191_v4 }
 0x12d   : > { %v279_v36 = vadd.f32 %v277_v34, %v225_v10  ;;  %v276_v37 = vadd.f32 %v274_v35, %v199_v9 }
 0x12f   : > { %v281_v38 = vadd.f32 %v279_v36, %v233_v15  ;;  %v278_v40 = vadd.f32 %v276_v37, %v599_v57 }
 0x131   : > { %v283_v41 = vadd.f32 %v281_v38, %v603_v58  ;;  %v280_v43 = vadd.f32 %v278_v40, %v227_v14 }
 0x133   : > { %v285_v44 = vadd.f32 %v283_v41, %v251_v20  ;;  %v282_v45 = vadd.f32 %v280_v43, %v235_v19 }
 0x135   : > { %v287_v46 = vadd.f32 %v285_v44, %v264_v25  ;;  %v284_v47 = vadd.f32 %v282_v45, %v606_v59 }
 0x137   : > { %v289_v48 = vadd.f32 %v287_v46, %v586_v39  ;;  %v286_v49 = vadd.f32 %v284_v47, %v253_v24 }
 0x139   : > { %v291_v50 = vadd.f32 %v289_v48, %v189_v2  ;;  %v288_v51 = vadd.f32 %v286_v49, %v266_v29 }
 0x13b   : > { %v293_v52 = vadd.f32 %v291_v50, %v197_v5  ;;  %v290_v53 = vadd.f32 %v288_v51, %v589_v42 }
 0x13d   : > { %v295_v54 = vadd.f32 %v293_v52, %v596_v56  ;;  %v292_v55 = vadd.f32 %v290_v53, %v191_v4 }
 0x13f   : > { %v297_v60 = vadd.f32 %v295_v54, %v225_v10  ;;  %v294_v61 = vadd.f32 %v292_v55, %v199_v9 }
 0x141   : > { %v299_v62 = vadd.f32 %v297_v60, %v233_v15  ;;  %v296_v63 = vadd.f32 %v294_v61, %v599_v57 }
 0x143   : > { %v301_v0 = vadd.f32 %v299_v62, %v603_v58  ;;  %v298_v39 = vadd.f32 %v296_v63, %v227_v14 }
 0x145   : > { %v303_v1 = vadd.f32 %v301_v0, %v251_v20  ;;  %v300_v2 = vadd.f32 %v298_v39, %v235_v19 }
 0x147   : > { %v305_v3 = vadd.f32 %v303_v1, %v264_v25  ;;  %v302_v42 = vadd.f32 %v300_v2, %v606_v59 }
 0x149   : > { %310 = vst.msk [vmem:[%s109_s27] sm:$0xff] %vm309_vm2, %v305_v3  ;;  %v304_v56 = vadd.f32 %v302_v42, %v253_v24 }
 0x14b   : > { %v306_v57 = vadd.f32 %v304_v56, %v266_v29 }
 0x14d   : > { %311 = vst.msk [vmem:[%s109_s27 + $0x8] sm:$0xff] %vm309_vm2, %v306_v57 }
 0x14e   : > { %457 = shalt.err (!%p454_p3)
}
 0x14f   : > { %s458_s14 = scalar_lea.hbm %s645_s3, 256  ;;  %s462_s20 = scalar_lea.hbm %s689_s1, 512 }
 0x150   : > { %p459_p4 = scmp.ne.s32.totalorder %s645_s3, %s458_s14  ;;  %p463_p9 = scmp.lt.u32.totalorder %s645_s3, %s689_s1 }
 0x151   : > { %p464_p10 = scmp.lt.u32.totalorder %s462_s20, %s458_s14  ;;  %p466_p12 = scmp.lt.u32.totalorder %s458_s14, %s645_s3 }
 0x152   : > { %p460_p7 = pnand %p459_p4, %p561_p5 }
 0x153   : > { %p465_p11 = por %p464_p10, %p463_p9 }
 0x154   : > { %p461_p8 = pneg %p460_p7 }
 0x155   : > { %p467_p13 = por %p466_p12, %p465_p11 }
 0x157   : > { %p468_p0 = pnand %p467_p13, %p461_p8 }
 0x159   : > { %471 = shalt.err (!%p468_p0)
}
 0x15a   : > { %s511_s23 = smov 128   ;;  %s512_s24 = smov 8  }
 0x15b   : > { %401 = dma.vmem_to_hbm [thread:$0]  (%p561_p5), %s640_s28, 256, %s645_s3, %s647_s4, %s511_s23, %s511_s23, %s512_s24  }
 0x15c PF: > { %p407_p1 = scmp.ge.s32.totalorder %s506_s9, 2  ;;  %s341_s25 = sand.u32 1, %s494_s6  }
 0x15d   : > { %s342_s26 = scalar_lea.sflag [#allocation3], %s341_s25 }
 0x15e   : > { %p404_p2 = pnand %p407_p1, %p565_p6 }
 0x160   : > { %489 = dma.done.wait (!%p404_p2), %s342_s26, 256  }
 0x161   : > { %491 = vsyncadd (!%p404_p2), %s342_s26, 4294967040  ;;  %p11_p3 = scmp.ge.s32.totalorder %s548_s12, 4   ;;  %s692_s6 = smov %s498_s7 }
 0x162   : > { %s693_s7 = smov %s502_s8  ;;  %s694_s8 = smov %s559_s15 }
 0x163   : > { %s695_s9 = smov %s548_s12  ;;  %13 = sbr.rel (!%p11_p3) target bundleno = 3 (0x3), region = 59 }
 0x16a   :  { %347 = vsyncpa [#allocation3], 1 }
 0x16b   :  { %349 = vsyncpa [#allocation3 + $0x1], 1 }

</bundles_post_ra>
